<compile_context>
chip_gen: v5e
topology: v5e:2x2
jax: 0.10.0
libtpu: 0.0.40
codegen_flags: <defaults>
</compile_context>

<pallas_src>
import jax
import jax.numpy as jnp
from jax.experimental import pallas as pl
from jax.experimental.pallas import tpu as pltpu


def _round_up(x, m):
    return (x + m - 1) // m * m


def _vmem():
    # Whole-array blocks resident in VMEM (all operands are small at these shapes).
    return pl.BlockSpec(memory_space=pltpu.MemorySpace.VMEM)


# --------------------------- fused forward kernel ---------------------------------
def fused_gcn_mlp_kernel(
    node_ids_ref,  # (N_pad, 1)  int32
    src_ids_ref,   # (E_pad, 1)  int32
    dst_ids_ref,   # (E_pad, 1)  int32
    adj_ref,       # (N_pad, N_pad) f32, adj[src, dst] = 1
    emb_ref,       # (IN_pad, HID) bf16
    w_all_ref,     # (L, HID, HID) bf16
    b_all_ref,     # (L, 1, HID)   f32
    w1s_ref,       # (HID, HID) bf16   (W1 rows for the src half of the concat)
    w1d_ref,       # (HID, HID) bf16   (W1 rows for the dst half of the concat)
    b1_ref,        # (1, HID)   f32
    w2_ref,        # (HID, OUT_pad) bf16
    b2_ref,        # (1, OUT_pad)   f32
    out_ref,       # (E_pad, OUT_pad) f32
    h_ref,         # scratch: (N_pad, HID) f32 — node features stay resident in VMEM
):
    n_pad, _ = h_ref.shape
    e_pad = out_ref.shape[0]
    in_feat_pad = emb_ref.shape[0]
    n_layers = w_all_ref.shape[0]

    # ---- Embedding lookup, fused: one-hot gather on the MXU (exact row select) ----
    node_oh = (
        jax.lax.broadcasted_iota(jnp.int32, (n_pad, in_feat_pad), 1)
        == node_ids_ref[...]
    ).astype(jnp.bfloat16)
    h_ref[...] = jnp.dot(node_oh, emb_ref[...], preferred_element_type=jnp.float32)

    # ---- Normalized adjacency A_hat = D_in^-1/2 A^T D_out^-1/2, built ONCE --------
    # (degree clamp to >=1 matches DGL GraphConv with allow_zero_in_degree=True)
    adj = adj_ref[...]
    inv_out = jax.lax.rsqrt(jnp.maximum(jnp.sum(adj, axis=1, keepdims=True), 1.0))
    inv_in = jax.lax.rsqrt(jnp.maximum(jnp.sum(adj, axis=0, keepdims=True), 1.0))
    a_hat_t = ((adj * inv_out) * inv_in).T.astype(jnp.bfloat16)  # (dst, src), bf16

    # ---- n_hidden_layers x GraphConv(norm='both'); H never leaves VMEM ------------
    # DGL GraphConv default activation=None -> no nonlinearity between layers.
    def layer_body(l, carry):
        h_bf = h_ref[...].astype(jnp.bfloat16)
        agg = jnp.dot(a_hat_t, h_bf, preferred_element_type=jnp.float32)
        h_ref[...] = (
            jnp.dot(agg.astype(jnp.bfloat16), w_all_ref[l],
                    preferred_element_type=jnp.float32)
            + b_all_ref[l]
        )
        return carry

    jax.lax.fori_loop(0, n_layers, layer_body, 0, unroll=True)

    # ---- Triplet endpoint gather: one-hot @ H on the MXU (stays on-chip) ----------
    h_bf = h_ref[...].astype(jnp.bfloat16)
    lane_node = jax.lax.broadcasted_iota(jnp.int32, (e_pad, n_pad), 1)
    oh_src = (lane_node == src_ids_ref[...]).astype(jnp.bfloat16)
    oh_dst = (lane_node == dst_ids_ref[...]).astype(jnp.bfloat16)
    h_src = jnp.dot(oh_src, h_bf, preferred_element_type=jnp.float32)
    h_dst = jnp.dot(oh_dst, h_bf, preferred_element_type=jnp.float32)

    # ---- MLP scorer: relu(concat(hs, hd) @ W1 + b1) @ W2 + b2 ---------------------
    # concat(hs, hd) @ W1 == hs @ W1[:H] + hd @ W1[H:]   (avoids in-kernel concat)
    z = (
        jnp.dot(h_src.astype(jnp.bfloat16), w1s_ref[...],
                preferred_element_type=jnp.float32)
        + jnp.dot(h_dst.astype(jnp.bfloat16), w1d_ref[...],
                  preferred_element_type=jnp.float32)
        + b1_ref[...]
    )
    z = jnp.maximum(z, 0.0)
    out_ref[...] = (
        jnp.dot(z.astype(jnp.bfloat16), w2_ref[...],
                preferred_element_type=jnp.float32)
        + b2_ref[...]
    )


# ------------------------------- forward (wrapper) ---------------------------------
@jax.jit
def gcn_mlp_forward(params, adj, node_feat, triplets):
    emb = params["embedding"]
    layers = params["layers"]
    w1, b1, w2, b2 = params["w1"], params["b1"], params["w2"], params["b2"]

    n = adj.shape[0]
    in_feat, hid = emb.shape
    out_feat = w2.shape[1]
    e = triplets.shape[0]

    # Padded sizes: MXU-friendly node dim, lane-dense output, 8-row-aligned edges.
    n_pad = max(_round_up(n, 8), 128)
    e_pad = _round_up(e, 8)
    out_pad = _round_up(out_feat, 128)
    in_feat_pad = _round_up(in_feat, 8)

    f32, bf16, i32 = jnp.float32, jnp.bfloat16, jnp.int32

    adj_p = jnp.zeros((n_pad, n_pad), f32).at[:n, :n].set(adj.astype(f32))
    node_ids = jnp.zeros((n_pad, 1), i32).at[:n, 0].set(node_feat.astype(i32))
    src_ids = jnp.zeros((e_pad, 1), i32).at[:e, 0].set(triplets[:, 0].astype(i32))
    dst_ids = jnp.zeros((e_pad, 1), i32).at[:e, 0].set(triplets[:, 2].astype(i32))
    emb_p = jnp.zeros((in_feat_pad, hid), bf16).at[:in_feat].set(emb.astype(bf16))

    w_all = jnp.stack([w for w, _ in layers]).astype(bf16)                  # (L,H,H)
    b_all = jnp.stack([b.reshape(1, hid) for _, b in layers]).astype(f32)   # (L,1,H)

    w1s = w1[:hid].astype(bf16)
    w1d = w1[hid:].astype(bf16)
    b1_p = b1.reshape(1, hid).astype(f32)
    w2_p = jnp.zeros((hid, out_pad), bf16).at[:, :out_feat].set(w2.astype(bf16))
    b2_p = jnp.zeros((1, out_pad), f32).at[:, :out_feat].set(
        b2.reshape(1, out_feat).astype(f32)
    )

    out = pl.pallas_call(
        fused_gcn_mlp_kernel,
        out_shape=jax.ShapeDtypeStruct((e_pad, out_pad), jnp.float32),
        in_specs=[_vmem()] * 12,
        out_specs=_vmem(),
        scratch_shapes=[pltpu.VMEM((n_pad, hid), jnp.float32)],
    )(node_ids, src_ids, dst_ids, adj_p, emb_p, w_all, b_all,
      w1s, w1d, b1_p, w2_p, b2_p)

    return out[:e, :out_feat]


# ------------------------------- pure-JAX reference --------------------------------
def _reference(params, adj, node_feat, triplets):
    h = jnp.take(params["embedding"], node_feat, axis=0)
    d_out = jnp.clip(adj.sum(axis=1), 1.0, None)
    d_in = jnp.clip(adj.sum(axis=0), 1.0, None)
    a_hat = (d_in[:, None] ** -0.5) * adj.T * (d_out[None, :] ** -0.5)
    for w, b in params["layers"]:
        h = a_hat @ h @ w + b
    hs = h[triplets[:, 0]]
    hd = h[triplets[:, 2]]
    z = jnp.maximum(
        jnp.concatenate([hs, hd], axis=1) @ params["w1"] + params["b1"], 0.0
    )
    return z @ params["w2"] + params["b2"]


if __name__ == "__main__":
    N, IN_FEAT, HID, OUT, N_LAYERS, E = 16, 10, 128, 8, 2, 8

    key = jax.random.PRNGKey(0)
    keys = jax.random.split(key, 10)

    # Synthetic graph + inputs.
    node_feat = jax.random.randint(keys[0], (N,), 0, IN_FEAT)                # (16,)
    adj = (jax.random.uniform(keys[1], (N, N)) < 0.3).astype(jnp.float32)    # (16,16)
    triplets = jnp.stack(
        [
            jax.random.randint(keys[2], (E,), 0, N),   # src
            jax.random.randint(keys[3], (E,), 0, 4),   # relation (unused by scorer)
            jax.random.randint(keys[4], (E,), 0, N),   # dst
        ],
        axis=1,
    )  # (8, 3)

    # Deterministic synthetic parameters.
    emb = jax.random.normal(keys[5], (IN_FEAT, HID), jnp.float32) * 0.1
    layer_keys = jax.random.split(keys[6], N_LAYERS)
    layers = []
    for i in range(N_LAYERS):
        w = jax.random.normal(layer_keys[i], (HID, HID), jnp.float32) * (HID ** -0.5)
        b = jnp.zeros((1, HID), jnp.float32)
        layers.append((w, b))
    w1 = jax.random.normal(keys[7], (2 * HID, HID), jnp.float32) * 0.05
    b1 = jnp.zeros((1, HID), jnp.float32)
    w2 = jax.random.normal(keys[8], (HID, OUT), jnp.float32) * 0.05
    b2 = jnp.zeros((1, OUT), jnp.float32)

    params = {
        "embedding": emb,
        "layers": layers,
        "w1": w1,
        "b1": b1,
        "w2": w2,
        "b2": b2,
    }

    score = gcn_mlp_forward(params, adj, node_feat, triplets)
    jax.block_until_ready(score)
    assert score.shape == (E, OUT)

    ref = _reference(params, adj, node_feat, triplets)
    assert jnp.allclose(score, ref, rtol=2e-1, atol=5e-3), (
        "fused kernel deviates from f32 reference beyond bf16 tolerance"
    )

    print("KERNEL_OK")
</pallas_src>

<mosaic_0001>
module attributes {stable_mosaic.version = 11 : i64} {
  func.func @fused_gcn_mlp_kernel(%arg0: memref<128x1xi32, #tpu.memory_space<vmem>>, %arg1: memref<8x1xi32, #tpu.memory_space<vmem>>, %arg2: memref<8x1xi32, #tpu.memory_space<vmem>>, %arg3: memref<128x128xf32, #tpu.memory_space<vmem>>, %arg4: memref<16x128xbf16, #tpu.memory_space<vmem>>, %arg5: memref<2x128x128xbf16, #tpu.memory_space<vmem>>, %arg6: memref<2x1x128xf32, #tpu.memory_space<vmem>>, %arg7: memref<128x128xbf16, #tpu.memory_space<vmem>>, %arg8: memref<128x128xbf16, #tpu.memory_space<vmem>>, %arg9: memref<1x128xf32, #tpu.memory_space<vmem>>, %arg10: memref<128x128xbf16, #tpu.memory_space<vmem>>, %arg11: memref<1x128xf32, #tpu.memory_space<vmem>>, %arg12: memref<8x128xf32, #tpu.memory_space<vmem>>, %arg13: memref<128x128xf32, #tpu.memory_space<vmem>>) attributes {dimension_semantics = [], scalar_prefetch = 0 : i64, scratch_operands = 1 : i64, tpu.core_type = #tpu.core_type<tc>} {
    %0 = tpu.iota {dimensions = array<i32: 1>} : vector<128x16xi32>
    %c0 = arith.constant 0 : index
    %c0_0 = arith.constant 0 : index
    %1 = vector.load %arg0[%c0, %c0_0] : memref<128x1xi32, #tpu.memory_space<vmem>>, vector<128x1xi32>
    %2 = vector.broadcast %1 : vector<128x1xi32> to vector<128x16xi32>
    %3 = arith.cmpi eq, %0, %2 : vector<128x16xi32>
    %4 = arith.extui %3 : vector<128x16xi1> to vector<128x16xi32>
    %5 = arith.sitofp %4 : vector<128x16xi32> to vector<128x16xf32>
    %6 = arith.truncf %5 : vector<128x16xf32> to vector<128x16xbf16>
    %c0_1 = arith.constant 0 : index
    %c0_2 = arith.constant 0 : index
    %7 = vector.load %arg4[%c0_1, %c0_2] : memref<16x128xbf16, #tpu.memory_space<vmem>>, vector<16x128xbf16>
    %cst = arith.constant dense<0.000000e+00> : vector<128x128xf32>
    %8 = tpu.matmul %6, %7, %cst {dimension_numbers = #tpu.dot_dimension_numbers<[1], [0], [0], [1], [0, 0, 1, 1], [], []>} : vector<128x16xbf16>, vector<16x128xbf16>, vector<128x128xf32> -> vector<128x128xf32>
    %c0_3 = arith.constant 0 : index
    %c0_4 = arith.constant 0 : index
    %9 = vector.load %arg13[%c0_3, %c0_4] : memref<128x128xf32, #tpu.memory_space<vmem>>, vector<128x128xf32>
    tpu.vector_store %arg13[%c0_3, %c0_4], %8 {strides = array<i32>} : memref<128x128xf32, #tpu.memory_space<vmem>>, vector<128x128xf32>,
    %c0_5 = arith.constant 0 : index
    %c0_6 = arith.constant 0 : index
    %10 = vector.load %arg3[%c0_5, %c0_6] : memref<128x128xf32, #tpu.memory_space<vmem>>, vector<128x128xf32>
    %cst_7 = arith.constant dense<0.000000e+00> : vector<128xf32>
    %11 = vector.multi_reduction <add>, %10, %cst_7 [1] : vector<128x128xf32> to vector<128xf32>
    %12 = vector.shape_cast %11 : vector<128xf32> to vector<128x1xf32>
    %cst_8 = arith.constant 1.000000e+00 : f32
    %13 = vector.broadcast %cst_8 : f32 to vector<128x1xf32>
    %14 = arith.maximumf %12, %13 : vector<128x1xf32>
    %15 = math.rsqrt %14 : vector<128x1xf32>
    %cst_9 = arith.constant dense<0.000000e+00> : vector<128xf32>
    %16 = vector.multi_reduction <add>, %10, %cst_9 [0] : vector<128x128xf32> to vector<128xf32>
    %17 = vector.shape_cast %16 : vector<128xf32> to vector<1x128xf32>
    %cst_10 = arith.constant 1.000000e+00 : f32
    %18 = vector.broadcast %cst_10 : f32 to vector<1x128xf32>
    %19 = arith.maximumf %17, %18 : vector<1x128xf32>
    %20 = math.rsqrt %19 : vector<1x128xf32>
    %21 = vector.broadcast %15 : vector<128x1xf32> to vector<128x128xf32>
    %22 = arith.mulf %10, %21 : vector<128x128xf32>
    %23 = vector.broadcast %20 : vector<1x128xf32> to vector<128x128xf32>
    %24 = arith.mulf %22, %23 : vector<128x128xf32>
    %25 = tpu.transpose %24, [1, 0] : vector<128x128xf32> -> vector<128x128xf32>
    %26 = arith.truncf %25 : vector<128x128xf32> to vector<128x128xbf16>
    %c0_i32 = arith.constant 0 : i32
    %c0_11 = arith.constant 0 : index
    %c0_12 = arith.constant 0 : index
    %27 = vector.load %arg13[%c0_11, %c0_12] : memref<128x128xf32, #tpu.memory_space<vmem>>, vector<128x128xf32>
    %28 = arith.truncf %27 : vector<128x128xf32> to vector<128x128xbf16>
    %cst_13 = arith.constant dense<0.000000e+00> : vector<128x128xf32>
    %29 = tpu.matmul %26, %28, %cst_13 {dimension_numbers = #tpu.dot_dimension_numbers<[1], [0], [0], [1], [0, 0, 1, 1], [], []>} : vector<128x128xbf16>, vector<128x128xbf16>, vector<128x128xf32> -> vector<128x128xf32>
    %30 = arith.truncf %29 : vector<128x128xf32> to vector<128x128xbf16>
    %31 = arith.index_cast %c0_i32 : i32 to index
    %c0_14 = arith.constant 0 : index
    %c0_15 = arith.constant 0 : index
    %32 = vector.load %arg5[%31, %c0_14, %c0_15] : memref<2x128x128xbf16, #tpu.memory_space<vmem>>, vector<1x128x128xbf16>
    %33 = vector.shape_cast %32 : vector<1x128x128xbf16> to vector<128x128xbf16>
    %cst_16 = arith.constant dense<0.000000e+00> : vector<128x128xf32>
    %34 = tpu.matmul %30, %33, %cst_16 {dimension_numbers = #tpu.dot_dimension_numbers<[1], [0], [0], [1], [0, 0, 1, 1], [], []>} : vector<128x128xbf16>, vector<128x128xbf16>, vector<128x128xf32> -> vector<128x128xf32>
    %35 = arith.index_cast %c0_i32 : i32 to index
    %c0_17 = arith.constant 0 : index
    %c0_18 = arith.constant 0 : index
    %36 = vector.load %arg6[%35, %c0_17, %c0_18] : memref<2x1x128xf32, #tpu.memory_space<vmem>>, vector<1x1x128xf32>
    %37 = vector.shape_cast %36 : vector<1x1x128xf32> to vector<1x128xf32>
    %38 = vector.broadcast %37 : vector<1x128xf32> to vector<128x128xf32>
    %39 = arith.addf %34, %38 : vector<128x128xf32>
    %c0_19 = arith.constant 0 : index
    %c0_20 = arith.constant 0 : index
    %40 = vector.load %arg13[%c0_19, %c0_20] : memref<128x128xf32, #tpu.memory_space<vmem>>, vector<128x128xf32>
    tpu.vector_store %arg13[%c0_19, %c0_20], %39 {strides = array<i32>} : memref<128x128xf32, #tpu.memory_space<vmem>>, vector<128x128xf32>,
    %c1_i32 = arith.constant 1 : i32
    %c0_21 = arith.constant 0 : index
    %c0_22 = arith.constant 0 : index
    %41 = vector.load %arg13[%c0_21, %c0_22] : memref<128x128xf32, #tpu.memory_space<vmem>>, vector<128x128xf32>
    %42 = arith.truncf %41 : vector<128x128xf32> to vector<128x128xbf16>
    %cst_23 = arith.constant dense<0.000000e+00> : vector<128x128xf32>
    %43 = tpu.matmul %26, %42, %cst_23 {dimension_numbers = #tpu.dot_dimension_numbers<[1], [0], [0], [1], [0, 0, 1, 1], [], []>} : vector<128x128xbf16>, vector<128x128xbf16>, vector<128x128xf32> -> vector<128x128xf32>
    %44 = arith.truncf %43 : vector<128x128xf32> to vector<128x128xbf16>
    %45 = arith.index_cast %c1_i32 : i32 to index
    %c0_24 = arith.constant 0 : index
    %c0_25 = arith.constant 0 : index
    %46 = vector.load %arg5[%45, %c0_24, %c0_25] : memref<2x128x128xbf16, #tpu.memory_space<vmem>>, vector<1x128x128xbf16>
    %47 = vector.shape_cast %46 : vector<1x128x128xbf16> to vector<128x128xbf16>
    %cst_26 = arith.constant dense<0.000000e+00> : vector<128x128xf32>
    %48 = tpu.matmul %44, %47, %cst_26 {dimension_numbers = #tpu.dot_dimension_numbers<[1], [0], [0], [1], [0, 0, 1, 1], [], []>} : vector<128x128xbf16>, vector<128x128xbf16>, vector<128x128xf32> -> vector<128x128xf32>
    %49 = arith.index_cast %c1_i32 : i32 to index
    %c0_27 = arith.constant 0 : index
    %c0_28 = arith.constant 0 : index
    %50 = vector.load %arg6[%49, %c0_27, %c0_28] : memref<2x1x128xf32, #tpu.memory_space<vmem>>, vector<1x1x128xf32>
    %51 = vector.shape_cast %50 : vector<1x1x128xf32> to vector<1x128xf32>
    %52 = vector.broadcast %51 : vector<1x128xf32> to vector<128x128xf32>
    %53 = arith.addf %48, %52 : vector<128x128xf32>
    %c0_29 = arith.constant 0 : index
    %c0_30 = arith.constant 0 : index
    %54 = vector.load %arg13[%c0_29, %c0_30] : memref<128x128xf32, #tpu.memory_space<vmem>>, vector<128x128xf32>
    tpu.vector_store %arg13[%c0_29, %c0_30], %53 {strides = array<i32>} : memref<128x128xf32, #tpu.memory_space<vmem>>, vector<128x128xf32>,
    %c2_i32 = arith.constant 2 : i32
    %c0_31 = arith.constant 0 : index
    %c0_32 = arith.constant 0 : index
    %55 = vector.load %arg13[%c0_31, %c0_32] : memref<128x128xf32, #tpu.memory_space<vmem>>, vector<128x128xf32>
    %56 = arith.truncf %55 : vector<128x128xf32> to vector<128x128xbf16>
    %57 = tpu.iota {dimensions = array<i32: 1>} : vector<8x128xi32>
    %c0_33 = arith.constant 0 : index
    %c0_34 = arith.constant 0 : index
    %58 = vector.load %arg1[%c0_33, %c0_34] : memref<8x1xi32, #tpu.memory_space<vmem>>, vector<8x1xi32>
    %59 = vector.broadcast %58 : vector<8x1xi32> to vector<8x128xi32>
    %60 = arith.cmpi eq, %57, %59 : vector<8x128xi32>
    %61 = arith.extui %60 : vector<8x128xi1> to vector<8x128xi32>
    %62 = arith.sitofp %61 : vector<8x128xi32> to vector<8x128xf32>
    %63 = arith.truncf %62 : vector<8x128xf32> to vector<8x128xbf16>
    %c0_35 = arith.constant 0 : index
    %c0_36 = arith.constant 0 : index
    %64 = vector.load %arg2[%c0_35, %c0_36] : memref<8x1xi32, #tpu.memory_space<vmem>>, vector<8x1xi32>
    %65 = vector.broadcast %64 : vector<8x1xi32> to vector<8x128xi32>
    %66 = arith.cmpi eq, %57, %65 : vector<8x128xi32>
    %67 = arith.extui %66 : vector<8x128xi1> to vector<8x128xi32>
    %68 = arith.sitofp %67 : vector<8x128xi32> to vector<8x128xf32>
    %69 = arith.truncf %68 : vector<8x128xf32> to vector<8x128xbf16>
    %cst_37 = arith.constant dense<0.000000e+00> : vector<8x128xf32>
    %70 = tpu.matmul %63, %56, %cst_37 {dimension_numbers = #tpu.dot_dimension_numbers<[1], [0], [0], [1], [0, 0, 1, 1], [], []>} : vector<8x128xbf16>, vector<128x128xbf16>, vector<8x128xf32> -> vector<8x128xf32>
    %cst_38 = arith.constant dense<0.000000e+00> : vector<8x128xf32>
    %71 = tpu.matmul %69, %56, %cst_38 {dimension_numbers = #tpu.dot_dimension_numbers<[1], [0], [0], [1], [0, 0, 1, 1], [], []>} : vector<8x128xbf16>, vector<128x128xbf16>, vector<8x128xf32> -> vector<8x128xf32>
    %72 = arith.truncf %70 : vector<8x128xf32> to vector<8x128xbf16>
    %c0_39 = arith.constant 0 : index
    %c0_40 = arith.constant 0 : index
    %73 = vector.load %arg7[%c0_39, %c0_40] : memref<128x128xbf16, #tpu.memory_space<vmem>>, vector<128x128xbf16>
    %cst_41 = arith.constant dense<0.000000e+00> : vector<8x128xf32>
    %74 = tpu.matmul %72, %73, %cst_41 {dimension_numbers = #tpu.dot_dimension_numbers<[1], [0], [0], [1], [0, 0, 1, 1], [], []>} : vector<8x128xbf16>, vector<128x128xbf16>, vector<8x128xf32> -> vector<8x128xf32>
    %75 = arith.truncf %71 : vector<8x128xf32> to vector<8x128xbf16>
    %c0_42 = arith.constant 0 : index
    %c0_43 = arith.constant 0 : index
    %76 = vector.load %arg8[%c0_42, %c0_43] : memref<128x128xbf16, #tpu.memory_space<vmem>>, vector<128x128xbf16>
    %cst_44 = arith.constant dense<0.000000e+00> : vector<8x128xf32>
    %77 = tpu.matmul %75, %76, %cst_44 {dimension_numbers = #tpu.dot_dimension_numbers<[1], [0], [0], [1], [0, 0, 1, 1], [], []>} : vector<8x128xbf16>, vector<128x128xbf16>, vector<8x128xf32> -> vector<8x128xf32>
    %78 = arith.addf %74, %77 : vector<8x128xf32>
    %c0_45 = arith.constant 0 : index
    %c0_46 = arith.constant 0 : index
    %79 = vector.load %arg9[%c0_45, %c0_46] : memref<1x128xf32, #tpu.memory_space<vmem>>, vector<1x128xf32>
    %80 = vector.broadcast %79 : vector<1x128xf32> to vector<8x128xf32>
    %81 = arith.addf %78, %80 : vector<8x128xf32>
    %cst_47 = arith.constant 0.000000e+00 : f32
    %82 = vector.broadcast %cst_47 : f32 to vector<8x128xf32>
    %83 = arith.maximumf %81, %82 : vector<8x128xf32>
    %84 = arith.truncf %83 : vector<8x128xf32> to vector<8x128xbf16>
    %c0_48 = arith.constant 0 : index
    %c0_49 = arith.constant 0 : index
    %85 = vector.load %arg10[%c0_48, %c0_49] : memref<128x128xbf16, #tpu.memory_space<vmem>>, vector<128x128xbf16>
    %cst_50 = arith.constant dense<0.000000e+00> : vector<8x128xf32>
    %86 = tpu.matmul %84, %85, %cst_50 {dimension_numbers = #tpu.dot_dimension_numbers<[1], [0], [0], [1], [0, 0, 1, 1], [], []>} : vector<8x128xbf16>, vector<128x128xbf16>, vector<8x128xf32> -> vector<8x128xf32>
    %c0_51 = arith.constant 0 : index
    %c0_52 = arith.constant 0 : index
    %87 = vector.load %arg11[%c0_51, %c0_52] : memref<1x128xf32, #tpu.memory_space<vmem>>, vector<1x128xf32>
    %88 = vector.broadcast %87 : vector<1x128xf32> to vector<8x128xf32>
    %89 = arith.addf %86, %88 : vector<8x128xf32>
    %c0_53 = arith.constant 0 : index
    %c0_54 = arith.constant 0 : index
    %90 = vector.load %arg12[%c0_53, %c0_54] : memref<8x128xf32, #tpu.memory_space<vmem>>, vector<8x128xf32>
    tpu.vector_store %arg12[%c0_53, %c0_54], %89 {strides = array<i32>} : memref<8x128xf32, #tpu.memory_space<vmem>>, vector<8x128xf32>,
    return
  }
}

</mosaic_0001>

<bundles_post_ra>
// kernel: gcn_mlp_forward.1
= control target key start
LH: loop header
LB: loop body
LE: loop exit
PB: predicated region body
PF: predicated region fallthrough
CT: control target
= control target key end

     0   :  { %v1672_v3 = vmov 0   ;;  %s2248_s0 = inlined_call_operand.vmem [shape: s32[128,1], index: 0, kind: input, shape index: {}]   ;;  %s2249_s1 = inlined_call_operand.vmem [shape: s32[8,1], index: 1, kind: input, shape index: {}]   ;;  %s2250_s2 = inlined_call_operand.vmem [shape: s32[8,1], index: 2, kind: input, shape index: {}]   ;;  %s2251_s3 = inlined_call_operand.vmem [shape: f32[128,128], index: 3, kind: input, shape index: {}]   ;;  %s2252_s4 = inlined_call_operand.vmem [shape: bf16[16,128], index: 4, kind: input, shape index: {}]   ;;  %s2253_s5 = inlined_call_operand.vmem [shape: bf16[2,128,128], index: 5, kind: input, shape index: {}]   ;;  %s2254_s6 = inlined_call_operand.vmem [shape: f32[2,1,128], index: 6, kind: input, shape index: {}]   ;;  %s2255_s7 = inlined_call_operand.vmem [shape: bf16[128,128], index: 7, kind: input, shape index: {}]   ;;  %s2256_s8 = inlined_call_operand.vmem [shape: bf16[128,128], index: 8, kind: input, shape index: {}]   ;;  %s2257_s9 = inlined_call_operand.vmem [shape: f32[1,128], index: 9, kind: input, shape index: {}]   ;;  %s2258_s10 = inlined_call_operand.vmem [shape: bf16[128,128], index: 10, kind: input, shape index: {}]   ;;  %s2259_s11 = inlined_call_operand.vmem [shape: f32[1,128], index: 11, kind: input, shape index: {}]   ;;  %s2260_s12 = inlined_call_operand.hbm [shape: f32[8,128], index: 12, kind: output, shape index: {}]  }
   0x1   :  { %v55_v0 = vld [vmem:[%s2248_s0 + $0x50] sm:$0xff]  ;;  %v45_v2 = vld [vmem:[%s2248_s0] sm:$0xff]  ;;  %1607 = vset.pattern.permute.xlu2 %v1672_v3  ;;  %1606 = vset.pattern.permute.xlu1 %v1672_v3 }
   0x2   :  { %v47_v1 = vld [vmem:[%s2248_s0 + $0x10] sm:$0xff]  ;;  %1605 = vset.pattern.permute.xlu0 %v1672_v3  ;;  %92 = vperm.xlu1 %1606, %v55_v0  }
   0x3   :  { %68 = vperm.xlu2 %1607, %v47_v1   ;;  %62 = vperm.xlu0 %1605, %v45_v2  }
   0x4   :  { %17 = vsyncpa [#allocation4], 0  ;;  %v56_v4 = vld [vmem:[%s2248_s0 + $0x58] sm:$0xff]  ;;  %v46_v6 = vld [vmem:[%s2248_s0 + $0x8] sm:$0xff]  ;;  %v43_v40 = vlaneseq  ;;  %v1673_v48 = vmov 0.0   ;;  %vm173_vm3 = vcmask 130048  }
   0x5   :  { %v48_v5 = vld [vmem:[%s2248_s0 + $0x18] sm:$0xff]  ;;  %v58_v7 = vld [vmem:[%s2248_s0 + $0x68] sm:$0xff]  ;;  %v49_v8 = vld [vmem:[%s2248_s0 + $0x20] sm:$0xff]  ;;  %s1339_s25 = sshll.u32 %s2260_s12, 4  ;;  %s1340_s25 = int_to_ptr.hbm [resolvable:$true] %s1339_s25 }
   0x6   :  { %v57_v9 = vld [vmem:[%s2248_s0 + $0x60] sm:$0xff]  ;;  %v59_v10 = vld [vmem:[%s2248_s0 + $0x70] sm:$0xff]  ;;  %v60_v11 = vld [vmem:[%s2248_s0 + $0x78] sm:$0xff]  ;;  %v1896_v44 = vand.u32 127, %v43_v40 }
   0x7   :  { %v50_v12 = vld [vmem:[%s2248_s0 + $0x28] sm:$0xff]  ;;  %v52_v13 = vld [vmem:[%s2248_s0 + $0x38] sm:$0xff]  ;;  %v53_v14 = vld [vmem:[%s2248_s0 + $0x40] sm:$0xff] }
   0x8   :  { %v51_v15 = vld [vmem:[%s2248_s0 + $0x30] sm:$0xff]  ;;  %v54_v16 = vld [vmem:[%s2248_s0 + $0x48] sm:$0xff]  ;;  %v1797_v18 = vld [vmem:[%s2251_s3] sm:$0xff] }
   0x9   :  { %v1792_v17 = vld [vmem:[%s2251_s3 + $0x8] sm:$0xff]  ;;  %v1804_v19 = vld [vmem:[%s2251_s3 + $0x18] sm:$0xff]  ;;  %v1809_v20 = vld [vmem:[%s2251_s3 + $0x20] sm:$0xff] }
   0xa   :  { %95 = vperm.xlu1 %1606, %v56_v4   ;;  %v1814_v21 = vld [vmem:[%s2251_s3 + $0x10] sm:$0xff]  ;;  %v1822_v22 = vld [vmem:[%s2251_s3 + $0x28] sm:$0xff]  ;;  %v1827_v23 = vld [vmem:[%s2251_s3 + $0x38] sm:$0xff]  ;;  %v487_v26 = vadd.f32 %v1792_v17, %v1797_v18 }
   0xb   :  { %71 = vperm.xlu2 %1607, %v48_v5   ;;  %65 = vperm.xlu0 %1605, %v46_v6   ;;  %v1832_v24 = vld [vmem:[%s2251_s3 + $0x30] sm:$0xff]  ;;  %v1559_v25 = vld [vmem:[%s2252_s4] sm:$0xff]  ;;  %v1851_v29 = vld [vmem:[%s2251_s3 + $0x48] sm:$0xff] }
   0xc   :  { %205 = vmatpush.bf16.msra.mxu0 %v1559_v25  ;;  %1600 = vmatpush.bf16.msra.mxu3 %v1559_v25  ;;  %v1845_v27 = vld [vmem:[%s2251_s3 + $0x40] sm:$0xff]  ;;  %v488_v28 = vadd.f32 %v487_v26, %v1814_v21  ;;  %v1859_v31 = vld [vmem:[%s2251_s3 + $0x50] sm:$0xff]  ;;  %v1865_v32 = vld [vmem:[%s2251_s3 + $0x58] sm:$0xff] }
   0xd   :  { %v1871_v34 = vld [vmem:[%s2251_s3 + $0x60] sm:$0xff]  ;;  %v1879_v36 = vld [vmem:[%s2251_s3 + $0x68] sm:$0xff]  ;;  %v1885_v37 = vld [vmem:[%s2251_s3 + $0x70] sm:$0xff] }
   0xe   :  { %v489_v30 = vadd.f32 %v488_v28, %v1804_v19  ;;  %v1890_v38 = vld [vmem:[%s2251_s3 + $0x78] sm:$0xff]  ;;  %v1045_v62 = vld [vmem:[%s2249_s1] sm:$0xff] }
   0xf   :  { %v1053_v63 = vld [vmem:[%s2250_s2] sm:$0xff] }
  0x10   :  { %v490_v33 = vadd.f32 %v489_v30, %v1809_v20 }
  0x12   :  { %101 = vperm.xlu1 %1606, %v58_v7   ;;  %v491_v35 = vadd.f32 %v490_v33, %v1822_v22 }
  0x13   :  { %74 = vperm.xlu2 %1607, %v49_v8   ;;  %98 = vperm.xlu0 %1605, %v57_v9  }
  0x14   :  { %v492_v39 = vadd.f32 %v491_v35, %v1832_v24 }
  0x16   :  { %v493_v43 = vadd.f32 %v492_v39, %v1827_v23 }
  0x18   :  { %v494_v46 = vadd.f32 %v493_v43, %v1845_v27 }
  0x1a   :  { %104 = vperm.xlu1 %1606, %v59_v10   ;;  %v495_v53 = vadd.f32 %v494_v46, %v1851_v29 }
  0x1b   :  { %107 = vperm.xlu2 %1607, %v60_v11   ;;  %77 = vperm.xlu0 %1605, %v50_v12  }
  0x1c   :  { %v496_v57 = vadd.f32 %v495_v53, %v1859_v31 }
  0x1e   :  { %v497_v61 = vadd.f32 %v496_v57, %v1865_v32 }
  0x20   :  { %v498_v0 = vadd.f32 %v497_v61, %v1871_v34 }
  0x22   :  { %83 = vperm.xlu1 %1606, %v52_v13   ;;  %v499_v6 = vadd.f32 %v498_v0, %v1879_v36 }
  0x23   :  { %86 = vperm.xlu2 %1607, %v53_v14   ;;  %80 = vperm.xlu0 %1605, %v51_v15  }
  0x24   :  { %v500_v9 = vadd.f32 %v499_v6, %v1885_v37 }
  0x26   :  { %v501_v11 = vadd.f32 %v500_v9, %v1890_v38 }
  0x28   :  { %v502_v14 = vrot.slane %v501_v11, 4 }
  0x2a   :  { %v503_v26 = vadd.f32 %v502_v14, %v501_v11 }
  0x2b   :  { %89 = vperm.xlu0 %1605, %v54_v16  }
  0x2c   :  { %v504_v35 = vrot.slane %v503_v26, 2 }
  0x2e   :  { %v505_v39 = vadd.f32 %v504_v35, %v503_v26 }
  0x4c   :  { %281 = vadd.xlane.f32.xlu2 %v1792_v17  ;;  %279 = vadd.xlane.f32.xlu1 %v1797_v18 }
  0x54   :  { %285 = vadd.xlane.f32.xlu2 %v1804_v19  ;;  %287 = vadd.xlane.f32.xlu1 %v1809_v20 }
  0x55   :  { %283 = vadd.xlane.f32.xlu0 %v1814_v21 }
  0x5c   :  { %289 = vadd.xlane.f32.xlu2 %v1822_v22  ;;  %293 = vadd.xlane.f32.xlu1 %v1827_v23 }
  0x5d   :  { %291 = vadd.xlane.f32.xlu0 %v1832_v24  ;;  %v69_v45 = vpop.permute.xlu2 %68 }
  0x5e   :  { %vm111_vm7 = vcmp.eq.s32.totalorder %v1896_v44, %v69_v45 }
  0x5f   :  { %v1350_v3 = vsel %vm111_vm7, 1.0, %v1673_v48 }
  0x64   :  { %295 = vadd.xlane.f32.xlu2 %v1845_v27  ;;  %299 = vadd.xlane.f32.xlu1 %v1859_v31 }
  0x65   :  { %297 = vadd.xlane.f32.xlu0 %v1851_v29  ;;  %v72_v58 = vpop.permute.xlu2 %71 }
  0x66   :  { %vm112_vm8 = vcmp.eq.s32.totalorder %v1896_v44, %v72_v58 }
  0x67   :  { %v1351_v4 = vsel %vm112_vm8, 1.0, %v1673_v48 }
  0x68   :  { %v158_v8 = vpack.c.bf16 %v1351_v4, %v1350_v3 }
  0x6c   :  { %301 = vadd.xlane.f32.xlu2 %v1865_v32  ;;  %305 = vadd.xlane.f32.xlu1 %v1879_v36 }
  0x6d   :  { %303 = vadd.xlane.f32.xlu0 %v1871_v34  ;;  %v75_v5 = vpop.permute.xlu2 %74 }
  0x6e   :  { %vm113_vm12 = vcmp.eq.s32.totalorder %v1896_v44, %v75_v5 }
  0x6f   :  { %v1352_v28 = vsel %vm113_vm12, 1.0, %v1673_v48 }
  0x74   :  { %307 = vadd.xlane.f32.xlu2 %v1885_v37  ;;  %v93_v41 = vpop.permute.xlu1 %92 }
  0x75   :  { %309 = vadd.xlane.f32.xlu0 %v1890_v38  ;;  %v63_v42 = vpop.permute.xlu0 %62  ;;  %vm119_vm1 = vcmp.eq.s32.totalorder %v1896_v44, %v93_v41  ;;  %v108_v13 = vpop.permute.xlu2 %107 }
  0x76   :  { %vm109_vm0 = vcmp.eq.s32.totalorder %v1896_v44, %v63_v42  ;;  %v1358_v51 = vsel %vm119_vm1, 1.0, %v1673_v48  ;;  %vm124_vm11 = vcmp.eq.s32.totalorder %v1896_v44, %v108_v13  ;;  %v506_v42 = vrot.slane %v505_v39, 1 }
  0x77   :  { %v1348_v49 = vsel %vm109_vm0, 1.0, %v1673_v48  ;;  %v1363_v25 = vsel %vm124_vm11, 1.0, %v1673_v48 }
  0x78   :  { %v507_v46 = vadd.f32 %v506_v42, %v505_v39 }
  0x7c   :  { %v96_v47 = vpop.permute.xlu1 %95 }
  0x7d   :  { %vm120_vm2 = vcmp.eq.s32.totalorder %v1896_v44, %v96_v47  ;;  %v66_v50 = vpop.permute.xlu0 %65 }
  0x7e   :  { %v1359_v52 = vsel %vm120_vm2, 1.0, %v1673_v48  ;;  %vm110_vm4 = vcmp.eq.s32.totalorder %v1896_v44, %v66_v50  ;;  %v87_v50 = vpop.permute.xlu2 %86 }
  0x7f   :  { %v162_v54 = vpack.c.bf16 %v1359_v52, %v1358_v51  ;;  %v1349_v55 = vsel %vm110_vm4, 1.0, %v1673_v48  ;;  %vm117_vm0 = vcmp.eq.s32.totalorder %v1896_v44, %v87_v50 }
  0x80   :  { %v157_v56 = vpack.c.bf16 %v1349_v55, %v1348_v49  ;;  %v508_v49 = vmax.f32 %v507_v46, 1.0 }
  0x81   :  { %1373 = vmatmul.msk.bf16.vlgmr.msra.gmra.mxu3 %vm173_vm3, %v162_v54  ;;  %v1356_v54 = vsel %vm117_vm0, 1.0, %v1673_v48 }
  0x82   :  { %1368 = vmatmul.msk.bf16.vlgmr.msra.gmra.mxu0 %vm173_vm3, %v157_v56  ;;  %1612 = vrsqrt.f32 %v508_v49  ;;  %vm515_vm1 = vweird.f32 %v508_v49 }
  0x84   :  { %v102_v59 = vpop.permute.xlu1 %101 }
  0x85   :  { %v99_v60 = vpop.permute.xlu0 %98  ;;  %vm122_vm5 = vcmp.eq.s32.totalorder %v1896_v44, %v102_v59 }
  0x86   :  { %vm121_vm6 = vcmp.eq.s32.totalorder %v1896_v44, %v99_v60  ;;  %v1361_v1 = vsel %vm122_vm5, 1.0, %v1673_v48 }
  0x87   :  { %v1360_v2 = vsel %vm121_vm6, 1.0, %v1673_v48 }
  0x88   :  { %v163_v7 = vpack.c.bf16 %v1361_v1, %v1360_v2  ;;  %v1613_v52 = vpop.eup %1612 }
  0x89   :  { %1047 = vperm.xlu0 %1605, %v1045_v62   ;;  %v510_v55 = vmul.f32 %v1613_v52, %v508_v49  ;;  %vm516_vm2 = vweird.f32 %v1613_v52 }
  0x8b   :  { %v511_v61 = vmul.f32 %v1613_v52, %v510_v55 }
  0x8c   :  { %1055 = vperm.xlu2 %1607, %v1053_v63   ;;  %v105_v10 = vpop.permute.xlu1 %104 }
  0x8d   :  { %v78_v12 = vpop.permute.xlu0 %77  ;;  %vm123_vm9 = vcmp.eq.s32.totalorder %v1896_v44, %v105_v10  ;;  %v512_v62 = vmul.f32 0.5, %v511_v61 }
  0x8e   :  { %vm114_vm10 = vcmp.eq.s32.totalorder %v1896_v44, %v78_v12  ;;  %v1362_v15 = vsel %vm123_vm9, 1.0, %v1673_v48 }
  0x8f   :  { %v1353_v16 = vsel %vm114_vm10, 1.0, %v1673_v48  ;;  %v164_v30 = vpack.c.bf16 %v1363_v25, %v1362_v15  ;;  %v513_v6 = vsub.f32 1.5, %v512_v62 }
  0x90   :  { %v159_v33 = vpack.c.bf16 %v1353_v16, %v1352_v28 }
  0x91   :  { %1374 = vmatmul.msk.bf16.gmra.mxu3 %vm173_vm3, %v163_v7  ;;  %v514_v12 = vmul.f32 %v1613_v52, %v513_v6 }
  0x92   :  { %1369 = vmatmul.msk.bf16.gmra.mxu0 %vm173_vm3, %v158_v8 }
  0x94   :  { %v84_v40 = vpop.permute.xlu1 %83 }
  0x95   :  { %v81_v41 = vpop.permute.xlu0 %80  ;;  %vm116_vm13 = vcmp.eq.s32.totalorder %v1896_v44, %v84_v40 }
  0x96   :  { %vm115_vm14 = vcmp.eq.s32.totalorder %v1896_v44, %v81_v41  ;;  %v1355_v43 = vsel %vm116_vm13, 1.0, %v1673_v48 }
  0x97   :  { %v1354_v45 = vsel %vm115_vm14, 1.0, %v1673_v48 }
  0x98   :  { %v160_v47 = vpack.c.bf16 %v1355_v43, %v1354_v45 }
  0x9d   :  { %v90_v51 = vpop.permute.xlu0 %89 }
  0x9e   :  { %vm118_vm15 = vcmp.eq.s32.totalorder %v1896_v44, %v90_v51 }
  0x9f   :  { %v1357_v53 = vsel %vm118_vm15, 1.0, %v1673_v48 }
  0xa0   :  { %v161_v58 = vpack.c.bf16 %v1357_v53, %v1356_v54 }
  0xa1   :  { %1375 = vmatmul.msk.bf16.gmra.mxu3 %vm173_vm3, %v164_v30 }
  0xa2   :  { %1370 = vmatmul.msk.bf16.gmra.mxu0 %vm173_vm3, %v159_v33 }
  0xb2   :  { %1371 = vmatmul.msk.bf16.gmra.mxu0 %vm173_vm3, %v160_v47 }
  0xbf   :  { %v282_v56 = vpop.xlane.xlu2 %281  ;;  %v280_v57 = vpop.xlane.xlu1 %279 }
  0xc0   :  { %v312_v59 = vmax.f32 %v282_v56, 1.0  ;;  %v311_v60 = vmax.f32 %v280_v57, 1.0 }
  0xc2   :  { %1614 = vrsqrt.f32 %v312_v59  ;;  %1372 = vmatmul.msk.bf16.gmra.mxu0 %vm173_vm3, %v161_v58  ;;  %vm517_vm3 = vmor %vm515_vm1, %vm516_vm2  ;;  %vm333_vm5 = vweird.f32 %v311_v60  ;;  %vm343_vm6 = vweird.f32 %v312_v59 }
  0xc3   :  { %1616 = vrsqrt.f32 %v311_v60  ;;  %v1959_v30 = vsel %vm517_vm3, %v1613_v52, %v514_v12 }
  0xc7   :  { %v286_v63 = vpop.xlane.xlu2 %285  ;;  %v288_v9 = vpop.xlane.xlu1 %287 }
  0xc8   :  { %v1615_v0 = vpop.eup %1614  ;;  %v1952_v1 = vmax.f32 %v286_v63, 1.0  ;;  %v284_v2 = vpop.xlane.xlu0 %283  ;;  %v1955_v13 = vmax.f32 %v288_v9, 1.0 }
  0xc9   :  { %v1617_v3 = vpop.eup %1616  ;;  %v338_v4 = vmul.f32 %v1615_v0, %v312_v59  ;;  %v313_v48 = vmax.f32 %v284_v2, 1.0  ;;  %vm344_vm7 = vweird.f32 %v1615_v0 }
  0xca   :  { %v328_v5 = vmul.f32 %v1617_v3, %v311_v60  ;;  %1618 = vrsqrt.f32 %v1952_v1  ;;  %vm334_vm4 = vweird.f32 %v1617_v3  ;;  %vm345_vm9 = vmor %vm343_vm6, %vm344_vm7  ;;  %vm363_vm13 = vweird.f32 %v1952_v1 }
  0xcb   :  { %v339_v7 = vmul.f32 %v1615_v0, %v338_v4  ;;  %1620 = vrsqrt.f32 %v313_v48  ;;  %vm335_vm8 = vmor %vm333_vm5, %vm334_vm4  ;;  %vm353_vm10 = vweird.f32 %v313_v48  ;;  %vm373_vm0 = vweird.f32 %v1955_v13 }
  0xcc   :  { %v329_v8 = vmul.f32 %v1617_v3, %v328_v5  ;;  %1622 = vrsqrt.f32 %v1955_v13 }
  0xcd   :  { %v340_v10 = vmul.f32 0.5, %v339_v7 }
  0xce   :  { %v330_v11 = vmul.f32 0.5, %v329_v8 }
  0xcf   :  { %v341_v15 = vsub.f32 1.5, %v340_v10  ;;  %v290_v43 = vpop.xlane.xlu2 %289  ;;  %v294_v2 = vpop.xlane.xlu1 %293 }
  0xd0   :  { %v1957_v14 = vpop.eup %1618  ;;  %v331_v16 = vsub.f32 1.5, %v330_v11  ;;  %v316_v45 = vmax.f32 %v290_v43, 1.0  ;;  %v292_v55 = vpop.xlane.xlu0 %291 }
  0xd1   :  { %v1621_v25 = vpop.eup %1620  ;;  %v342_v33 = vmul.f32 %v1615_v0, %v341_v15  ;;  %v358_v35 = vmul.f32 %v1957_v14, %v1952_v1  ;;  %v1969_v56 = vmax.f32 %v292_v55, 1.0  ;;  %vm364_vm14 = vweird.f32 %v1957_v14 }
  0xd2   :  { %v332_v26 = vmul.f32 %v1617_v3, %v331_v16  ;;  %v348_v28 = vmul.f32 %v1621_v25, %v313_v48  ;;  %v1623_v51 = vpop.eup %1622  ;;  %1624 = vrsqrt.f32 %v316_v45  ;;  %vm354_vm11 = vweird.f32 %v1621_v25  ;;  %vm365_vm15 = vmor %vm363_vm13, %vm364_vm14 }
  0xd3   :  { %v346_v47 = vsel %vm345_vm9, %v1615_v0, %v342_v33  ;;  %v359_v49 = vmul.f32 %v1957_v14, %v358_v35  ;;  %vm355_vm12 = vmor %vm353_vm10, %vm354_vm11  ;;  %1626 = vrsqrt.f32 %v1969_v56  ;;  %vm374_vm1 = vweird.f32 %v1623_v51 }
  0xd4   :  { %v349_v39 = vmul.f32 %v1621_v25, %v348_v28  ;;  %v336_v40 = vsel %vm335_vm8, %v1617_v3, %v332_v26  ;;  %v520_v52 = vmul.f32 %v346_v47, %v1792_v17  ;;  %v1977_v3 = vmax.f32 %v294_v2, 1.0  ;;  %vm375_vm2 = vmor %vm373_vm0, %vm374_vm1 }
  0xd5   :  { %v519_v41 = vmul.f32 %v336_v40, %v1797_v18  ;;  %v360_v53 = vmul.f32 0.5, %v359_v49  ;;  %v368_v18 = vmul.f32 %v1623_v51, %v1955_v13  ;;  %vm383_vm3 = vweird.f32 %v316_v45 }
  0xd6   :  { %v350_v42 = vmul.f32 0.5, %v349_v39  ;;  %v536_v57 = vmul.f32 %v520_v52, %v1959_v30  ;;  %1628 = vrsqrt.f32 %v1977_v3  ;;  %vm393_vm6 = vweird.f32 %v1969_v56 }
  0xd7   :  { %v535_v46 = vmul.f32 %v519_v41, %v1959_v30  ;;  %v361_v58 = vsub.f32 1.5, %v360_v53  ;;  %v369_v60 = vmul.f32 %v1623_v51, %v368_v18  ;;  %v296_v10 = vpop.xlane.xlu2 %295  ;;  %v300_v49 = vpop.xlane.xlu1 %299  ;;  %vm403_vm9 = vweird.f32 %v1977_v3 }
  0xd8   :  { %v351_v50 = vsub.f32 1.5, %v350_v42  ;;  %v1625_v61 = vpop.eup %1624  ;;  %v1985_v11 = vmax.f32 %v296_v10, 1.0  ;;  %v298_v33 = vpop.xlane.xlu0 %297 }
  0xd9   :  { %551 = vxpose.xlu1.b32.start [1/16] %v535_v46, 128  ;;  %v362_v62 = vmul.f32 %v1957_v14, %v361_v58  ;;  %v378_v63 = vmul.f32 %v1625_v61, %v316_v45  ;;  %v370_v0 = vmul.f32 0.5, %v369_v60  ;;  %v1627_v6 = vpop.eup %1626  ;;  %vm384_vm4 = vweird.f32 %v1625_v61 }
  0xda   :  { %v352_v54 = vmul.f32 %v1621_v25, %v351_v50  ;;  %v388_v9 = vmul.f32 %v1627_v6, %v1969_v56  ;;  %1630 = vrsqrt.f32 %v1985_v11  ;;  %vm385_vm5 = vmor %vm383_vm3, %vm384_vm4  ;;  %v1991_v35 = vmax.f32 %v298_v33, 1.0 }
  0xdb   :  { %v366_v48 = vsel %vm365_vm15, %v1957_v14, %v362_v62  ;;  %v379_v5 = vmul.f32 %v1625_v61, %v378_v63  ;;  %v371_v1 = vsub.f32 1.5, %v370_v0  ;;  %vm394_vm7 = vweird.f32 %v1627_v6 }
  0xdc   :  { %v356_v59 = vsel %vm355_vm12, %v1621_v25, %v352_v54  ;;  %v389_v16 = vmul.f32 %v1627_v6, %v388_v9  ;;  %v1629_v25 = vpop.eup %1628  ;;  %1632 = vrsqrt.f32 %v1991_v35  ;;  %vm395_vm8 = vmor %vm393_vm6, %vm394_vm7  ;;  %v1998_v50 = vmax.f32 %v300_v49, 1.0 }
  0xdd   :  { %v521_v17 = vmul.f32 %v356_v59, %v1814_v21  ;;  %v522_v21 = vmul.f32 %v366_v48, %v1804_v19  ;;  %v380_v7 = vmul.f32 0.5, %v379_v5  ;;  %v372_v8 = vmul.f32 %v1623_v51, %v371_v1 }
  0xde   :  { %v390_v26 = vmul.f32 0.5, %v389_v16  ;;  %v398_v28 = vmul.f32 %v1629_v25, %v1977_v3  ;;  %vm404_vm10 = vweird.f32 %v1629_v25  ;;  %1634 = vrsqrt.f32 %v1998_v50 }
  0xdf   :  { %v537_v4 = vmul.f32 %v521_v17, %v1959_v30  ;;  %v538_v12 = vmul.f32 %v522_v21, %v1959_v30  ;;  %v381_v14 = vsub.f32 1.5, %v380_v7  ;;  %v376_v15 = vsel %vm375_vm2, %v1623_v51, %v372_v8  ;;  %vm405_vm11 = vmor %vm403_vm9, %vm404_vm10  ;;  %v302_v60 = vpop.xlane.xlu2 %301 }
  0xe0   :  { %v523_v19 = vmul.f32 %v376_v15, %v1809_v20  ;;  %v391_v41 = vsub.f32 1.5, %v390_v26  ;;  %v399_v42 = vmul.f32 %v1629_v25, %v398_v28  ;;  %v1631_v43 = vpop.eup %1630  ;;  %vm413_vm12 = vweird.f32 %v1985_v11 }
  0xe1   :  { %552 = vxpose.xlu1.b32.cont [2/16] %v536_v57, 128  ;;  %v382_v13 = vmul.f32 %v1625_v61, %v381_v14  ;;  %v408_v45 = vmul.f32 %v1631_v43, %v1985_v11  ;;  %vm414_vm13 = vweird.f32 %v1631_v43  ;;  %vm423_vm15 = vweird.f32 %v1991_v35 }
  0xe2   :  { %v539_v39 = vmul.f32 %v523_v19, %v1959_v30  ;;  %v392_v46 = vmul.f32 %v1627_v6, %v391_v41  ;;  %v400_v47 = vmul.f32 0.5, %v399_v42  ;;  %v1633_v55 = vpop.eup %1632  ;;  %vm415_vm14 = vmor %vm413_vm12, %vm414_vm13  ;;  %vm433_vm2 = vweird.f32 %v1998_v50 }
  0xe3   :  { %v386_v40 = vsel %vm385_vm5, %v1625_v61, %v382_v13  ;;  %v409_v53 = vmul.f32 %v1631_v43, %v408_v45  ;;  %v418_v57 = vmul.f32 %v1633_v55, %v1991_v35  ;;  %v2009_v61 = vmax.f32 %v302_v60, 1.0 }
  0xe4   :  { %v524_v20 = vmul.f32 %v386_v40, %v1822_v22  ;;  %v396_v54 = vsel %vm395_vm8, %v1627_v6, %v392_v46  ;;  %v401_v18 = vsub.f32 1.5, %v400_v47  ;;  %v304_v6 = vpop.xlane.xlu0 %303  ;;  %vm424_vm0 = vweird.f32 %v1633_v55 }
  0xe5   :  { %v525_v22 = vmul.f32 %v396_v54, %v1832_v24  ;;  %v410_v56 = vmul.f32 0.5, %v409_v53  ;;  %v419_v0 = vmul.f32 %v1633_v55, %v418_v57  ;;  %v1635_v24 = vpop.eup %1634  ;;  %1636 = vrsqrt.f32 %v2009_v61  ;;  %vm425_vm1 = vmor %vm423_vm15, %vm424_vm0 }
  0xe6   :  { %v540_v52 = vmul.f32 %v524_v20, %v1959_v30  ;;  %v402_v58 = vmul.f32 %v1629_v25, %v401_v18  ;;  %v428_v5 = vmul.f32 %v1635_v24, %v1998_v50  ;;  %v2020_v21 = vmax.f32 %v304_v6, 1.0 }
  0xe7   :  { %v541_v62 = vmul.f32 %v525_v22, %v1959_v30  ;;  %v411_v63 = vsub.f32 1.5, %v410_v56  ;;  %v420_v48 = vmul.f32 0.5, %v419_v0  ;;  %vm434_vm3 = vweird.f32 %v1635_v24  ;;  %v308_v45 = vpop.xlane.xlu2 %307 }
  0xe8   :  { %v406_v2 = vsel %vm405_vm11, %v1629_v25, %v402_v58  ;;  %v429_v11 = vmul.f32 %v1635_v24, %v428_v5  ;;  %1638 = vrsqrt.f32 %v2020_v21  ;;  %v306_v25 = vpop.xlane.xlu1 %305  ;;  %vm435_vm4 = vmor %vm433_vm2, %vm434_vm3  ;;  %v2040_v46 = vmax.f32 %v308_v45, 1.0 }
  0xe9   :  { %553 = vxpose.xlu1.b32.cont [3/16] %v537_v4, 128  ;;  %v526_v3 = vmul.f32 %v406_v2, %v1827_v23  ;;  %v412_v4 = vmul.f32 %v1631_v43, %v411_v63  ;;  %v421_v10 = vsub.f32 1.5, %v420_v48  ;;  %v2031_v13 = vmax.f32 %v306_v25, 1.0 }
  0xea   :  { %v430_v16 = vmul.f32 0.5, %v429_v11  ;;  %vm443_vm5 = vweird.f32 %v2009_v61  ;;  %vm453_vm8 = vweird.f32 %v2020_v21 }
  0xeb   :  { %v542_v8 = vmul.f32 %v526_v3, %v1959_v30  ;;  %v416_v9 = vsel %vm415_vm14, %v1631_v43, %v412_v4  ;;  %v422_v15 = vmul.f32 %v1633_v55, %v421_v10  ;;  %1640 = vrsqrt.f32 %v2031_v13 }
  0xec   :  { %v527_v23 = vmul.f32 %v416_v9, %v1845_v27  ;;  %1642 = vrsqrt.f32 %v2040_v46  ;;  %v310_v57 = vpop.xlane.xlu0 %309  ;;  %vm463_vm11 = vweird.f32 %v2031_v13  ;;  %vm473_vm14 = vweird.f32 %v2040_v46 }
  0xed   :  { %v426_v35 = vsel %vm425_vm1, %v1633_v55, %v422_v15  ;;  %v326_v58 = vmax.f32 %v310_v57, 1.0 }
  0xee   :  { %v543_v28 = vmul.f32 %v527_v23, %v1959_v30  ;;  %v528_v40 = vmul.f32 %v426_v35, %v1851_v29 }
  0xef   :  { %1644 = vrsqrt.f32 %v326_v58  ;;  %vm483_vm1 = vweird.f32 %v326_v58 }
  0xf0   :  { %v544_v49 = vmul.f32 %v528_v40, %v1959_v30 }
  0xf1   :  { %554 = vxpose.xlu1.b32.cont [4/16] %v538_v12, 128  ;;  %v1637_v12 = vpop.eup %1636 }
  0xf2   :  { %v438_v14 = vmul.f32 %v1637_v12, %v2009_v61  ;;  %v1639_v27 = vpop.eup %1638  ;;  %vm444_vm6 = vweird.f32 %v1637_v12 }
  0xf3   :  { %v448_v42 = vmul.f32 %v1639_v27, %v2020_v21  ;;  %v1641_v54 = vpop.eup %1640  ;;  %vm445_vm7 = vmor %vm443_vm5, %vm444_vm6  ;;  %vm454_vm9 = vweird.f32 %v1639_v27 }
  0xf4   :  { %v439_v33 = vmul.f32 %v1637_v12, %v438_v14  ;;  %v458_v22 = vmul.f32 %v1641_v54, %v2031_v13  ;;  %v1643_v2 = vpop.eup %1642  ;;  %vm455_vm10 = vmor %vm453_vm8, %vm454_vm9  ;;  %vm464_vm12 = vweird.f32 %v1641_v54 }
  0xf5   :  { %v449_v50 = vmul.f32 %v1639_v27, %v448_v42  ;;  %vm465_vm13 = vmor %vm463_vm11, %vm464_vm12  ;;  %vm474_vm15 = vweird.f32 %v1643_v2 }
  0xf6   :  { %v440_v41 = vmul.f32 0.5, %v439_v33  ;;  %v459_v61 = vmul.f32 %v1641_v54, %v458_v22  ;;  %vm475_vm0 = vmor %vm473_vm14, %vm474_vm15 }
  0xf7   :  { %v450_v55 = vmul.f32 0.5, %v449_v50 }
  0xf8   :  { %v460_v4 = vmul.f32 0.5, %v459_v61 }
  0xf9   :  { %555 = vxpose.xlu1.b32.cont [5/16] %v539_v39, 128  ;;  %v431_v39 = vsub.f32 1.5, %v430_v16  ;;  %v451_v0 = vsub.f32 1.5, %v450_v55 }
  0xfa   :  { %v461_v11 = vsub.f32 1.5, %v460_v4  ;;  %v1562_v4 = vld [vmem:[%s2253_s5 + $0x10] sm:$0xff] }
  0xfb   :  { %v432_v43 = vmul.f32 %v1635_v24, %v431_v39  ;;  %v452_v3 = vmul.f32 %v1639_v27, %v451_v0 }
  0xfc   :  { %v462_v15 = vmul.f32 %v1641_v54, %v461_v11 }
  0xfd   :  { %v436_v53 = vsel %vm435_vm4, %v1635_v24, %v432_v43  ;;  %v468_v24 = vmul.f32 %v1643_v2, %v2040_v46  ;;  %v456_v10 = vsel %vm455_vm10, %v1639_v27, %v452_v3  ;;  %v1563_v3 = vld [vmem:[%s2253_s5 + $0x18] sm:$0xff] }
  0xfe   :  { %v529_v29 = vmul.f32 %v436_v53, %v1859_v31  ;;  %v466_v35 = vsel %vm465_vm13, %v1641_v54, %v462_v15 }
  0xff   :  { %v2000_v51 = vpop.f32.mrf.mxu0  ;;  %v469_v9 = vmul.f32 %v1643_v2, %v468_v24 }
 0x101   :  { %556 = vxpose.xlu1.b32.cont [6/16] %v540_v52, 128  ;;  %v441_v52 = vsub.f32 1.5, %v440_v41  ;;  %v470_v23 = vmul.f32 0.5, %v469_v9 }
 0x103   :  { %v442_v18 = vmul.f32 %v1637_v12, %v441_v52  ;;  %v471_v33 = vsub.f32 1.5, %v470_v23 }
 0x104   :  { %v2007_v59 = vpop.f32.mrf.mxu3 }
 0x105   :  { %v446_v63 = vsel %vm445_vm7, %v1637_v12, %v442_v18  ;;  %v1645_v12 = vpop.eup %1644  ;;  %v472_v13 = vmul.f32 %v1643_v2, %v471_v33 }
 0x106   :  { %v530_v31 = vmul.f32 %v446_v63, %v1865_v32  ;;  %v531_v32 = vmul.f32 %v456_v10, %v1871_v34  ;;  %v478_v14 = vmul.f32 %v1645_v12, %v326_v58  ;;  %v532_v34 = vmul.f32 %v466_v35, %v1879_v36  ;;  %v1566_v63 = vld [vmem:[%s2253_s5 + $0x30] sm:$0xff] }
 0x107   :  { %v2011_v17 = vpop.f32.mrf.mxu0  ;;  %vm484_vm2 = vweird.f32 %v1645_v12 }
 0x108   :  { %v548_v40 = vmul.f32 %v532_v34, %v1959_v30  ;;  %vm485_vm3 = vmor %vm483_vm1, %vm484_vm2  ;;  %v607_v53 = vpack.c.bf16 %v2011_v17, %v2000_v51 }
 0x109   :  { %557 = vxpose.xlu1.b32.cont [7/16] %v541_v62, 128  ;;  %v545_v62 = vmul.f32 %v529_v29, %v1959_v30 }
 0x10c   :  { %v2018_v1 = vpop.f32.mrf.mxu3 }
 0x10d   :  { %v612_v16 = vpack.c.bf16 %v2018_v1, %v2007_v59  ;;  %v476_v59 = vsel %vm475_vm0, %v1643_v2, %v472_v13  ;;  %v1565_v2 = vld [vmem:[%s2253_s5 + $0x28] sm:$0xff] }
 0x10e   :  { %v533_v41 = vmul.f32 %v476_v59, %v1885_v37 }
 0x10f   :  { %v2022_v7 = vpop.f32.mrf.mxu0 }
 0x111   :  { %558 = vxpose.xlu1.b32.cont [8/16] %v542_v8, 128  ;;  %v546_v8 = vmul.f32 %v530_v31, %v1959_v30  ;;  %v1564_v31 = vld [vmem:[%s2253_s5 + $0x20] sm:$0xff] }
 0x114   :  { %v2029_v19 = vpop.f32.mrf.mxu3 }
 0x117   :  { %v2033_v26 = vpop.f32.mrf.mxu0 }
 0x118   :  { %v608_v37 = vpack.c.bf16 %v2033_v26, %v2022_v7 }
 0x119   :  { %559 = vxpose.xlu1.b32.cont [9/16] %v543_v28, 128  ;;  %v547_v28 = vmul.f32 %v531_v32, %v1959_v30 }
 0x11c   :  { %v239_v20 = vpop.f32.mrf.mxu3 }
 0x11d   :  { %v613_v21 = vpack.c.bf16 %v239_v20, %v2029_v19  ;;  %v479_v19 = vmul.f32 %v1645_v12, %v478_v14  ;;  %v549_v20 = vmul.f32 %v533_v41, %v1959_v30 }
 0x11f   :  { %v2042_v47 = vpop.f32.mrf.mxu0  ;;  %v480_v39 = vmul.f32 0.5, %v479_v19 }
 0x121   :  { %560 = vxpose.xlu1.b32.cont [10/16] %v544_v49, 128  ;;  %v481_v1 = vsub.f32 1.5, %v480_v39 }
 0x123   :  { %v482_v42 = vmul.f32 %v1645_v12, %v481_v1 }
 0x124   :  { %v242_v56 = vpop.f32.mrf.mxu3 }
 0x125   :  { %v486_v45 = vsel %vm485_vm3, %v1645_v12, %v482_v42 }
 0x126   :  { %v534_v46 = vmul.f32 %v486_v45, %v1890_v38 }
 0x127   :  { %v2049_v60 = vpop.f32.mrf.mxu0 }
 0x128   :  { %v550_v52 = vmul.f32 %v534_v46, %v1959_v30  ;;  %v609_v50 = vpack.c.bf16 %v2049_v60, %v2042_v47  ;;  %v1608_v46 = vld [vmem:[%s2254_s6] ss:$0 sm:$0xff] }
 0x129   :  { %561 = vxpose.xlu1.b32.cont [11/16] %v545_v62, 128  ;;  %v1567_v62 = vld [vmem:[%s2253_s5 + $0x38] sm:$0xff] }
 0x12a   :  { %740 = vmatpush.bf16.msra.mxu2 %v1567_v62 }
 0x12c   :  { %v244_v48 = vpop.f32.mrf.mxu3 }
 0x12d   :  { %v614_v5 = vpack.c.bf16 %v244_v48, %v242_v56 }
 0x12e   :  { %741 = vmatpush.bf16.msra.mxu2 %v1566_v63 }
 0x12f   :  { %v222_v6 = vpop.f32.mrf.mxu0  ;;  %615 = vmatpush.bf16.msra.mxu1 %v614_v5  ;;  %v1561_v5 = vld [vmem:[%s2253_s5 + $0x8] sm:$0xff] }
 0x131   :  { %562 = vxpose.xlu1.b32.cont [12/16] %v546_v8, 128  ;;  %v1560_v8 = vld [vmem:[%s2253_s5] sm:$0xff] }
 0x132   :  { %742 = vmatpush.bf16.msra.mxu2 %v1565_v2 }
 0x133   :  { %616 = vmatpush.bf16.msra.mxu1 %v613_v21 }
 0x136   :  { %743 = vmatpush.bf16.msra.mxu2 %v1564_v31 }
 0x137   :  { %v224_v25 = vpop.f32.mrf.mxu0  ;;  %617 = vmatpush.bf16.msra.mxu1 %v612_v16 }
 0x138   :  { %v610_v49 = vpack.c.bf16 %v224_v25, %v222_v6 }
 0x139   :  { %563 = vxpose.xlu1.b32.cont [13/16] %v547_v28, 128 }
 0x13a   :  { %744 = vmatpush.bf16.msra.mxu2 %v1563_v3 }
 0x13e   :  { %745 = vmatpush.bf16.msra.mxu2 %v1562_v4 }
 0x13f   :  { %v227_v27 = vpop.f32.mrf.mxu0 }
 0x141   :  { %564 = vxpose.xlu1.b32.cont [14/16] %v548_v40, 128 }
 0x142   :  { %746 = vmatpush.bf16.msra.mxu2 %v1561_v5 }
 0x146   :  { %747 = vmatpush.bf16.msra.mxu2 %v1560_v8 }
 0x147   :  { %v229_v43 = vpop.f32.mrf.mxu0 }
 0x148   :  { %v611_v36 = vpack.c.bf16 %v229_v43, %v227_v27 }
 0x149   :  { %565 = vxpose.xlu1.b32.cont [15/16] %v549_v20, 128 }
 0x14a   :  { %618 = vmatpush.bf16.msra.mxu1 %v611_v36 }
 0x14e   :  { %619 = vmatpush.bf16.msra.mxu1 %v610_v49 }
 0x151   :  { %566 = vxpose.xlu1.b32.end [16/16] %v550_v52, 128 }
 0x152   :  { %620 = vmatpush.bf16.msra.mxu1 %v609_v50 }
 0x156   :  { %621 = vmatpush.bf16.msra.mxu1 %v608_v37 }
 0x15a   :  { %622 = vmatpush.bf16.msra.mxu1 %v607_v53 }
 0x17d   :  { %v567_v54 = vpop.trf.xlu1 }
 0x185   :  { %v568_v29 = vpop.trf.xlu1 }
 0x186   :  { %v2075_v38 = vpack.c.bf16 %v568_v29, %v567_v54 }
 0x188   :  { %623 = vmatmul.bf16.vlgmr.msra.gmra.mxu1 %v2075_v38 }
 0x18d   :  { %v569_v30 = vpop.trf.xlu1 }
 0x195   :  { %v570_v18 = vpop.trf.xlu1 }
 0x196   :  { %v2078_v55 = vpack.c.bf16 %v570_v18, %v569_v30 }
 0x198   :  { %628 = vmatmul.bf16.gmra.mxu1 %v2078_v55 }
 0x19d   :  { %v571_v47 = vpop.trf.xlu1 }
 0x1a5   :  { %v572_v22 = vpop.trf.xlu1 }
 0x1a6   :  { %v2081_v7 = vpack.c.bf16 %v572_v22, %v571_v47 }
 0x1a8   :  { %633 = vmatmul.bf16.gmra.mxu1 %v2081_v7 }
 0x1ad   :  { %v573_v51 = vpop.trf.xlu1 }
 0x1b5   :  { %v574_v17 = vpop.trf.xlu1 }
 0x1b6   :  { %v2084_v26 = vpack.c.bf16 %v574_v17, %v573_v51 }
 0x1b8   :  { %638 = vmatmul.bf16.gmra.mxu1 %v2084_v26 }
 0x1bd   :  { %v575_v56 = vpop.trf.xlu1 }
 0x1c5   :  { %v576_v57 = vpop.trf.xlu1 }
 0x1c6   :  { %v2087_v58 = vpack.c.bf16 %v576_v57, %v575_v56 }
 0x1c8   :  { %643 = vmatmul.bf16.gmra.mxu1 %v2087_v58 }
 0x1cd   :  { %v577_v60 = vpop.trf.xlu1 }
 0x1d5   :  { %v578_v0 = vpop.trf.xlu1 }
 0x1d6   :  { %v2096_v61 = vpack.c.bf16 %v578_v0, %v577_v60 }
 0x1d8   :  { %648 = vmatmul.bf16.gmra.mxu1 %v2096_v61 }
 0x1dd   :  { %v579_v24 = vpop.trf.xlu1 }
 0x1e5   :  { %v580_v48 = vpop.trf.xlu1 }
 0x1e6   :  { %v2114_v6 = vpack.c.bf16 %v580_v48, %v579_v24 }
 0x1e8   :  { %653 = vmatmul.bf16.gmra.mxu1 %v2114_v6 }
 0x1ed   :  { %v581_v9 = vpop.trf.xlu1 }
 0x1f5   :  { %v582_v10 = vpop.trf.xlu1 }
 0x1f6   :  { %v2120_v11 = vpack.c.bf16 %v582_v10, %v581_v9 }
 0x1f8   :  { %658 = vmatmul.bf16.gmra.mxu1 %v2120_v11 }
 0x205   :  { %v624_v12 = vpop.f32.mrf.mxu1 }
 0x20d   :  { %v626_v21 = vpop.f32.mrf.mxu1 }
 0x20e   :  { %v664_v32 = vpack.c.bf16 %v626_v21, %v624_v12 }
 0x210   :  { %748 = vmatmul.bf16.vlgmr.msra.gmra.mxu2 %v664_v32 }
 0x215   :  { %v629_v23 = vpop.f32.mrf.mxu1 }
 0x21d   :  { %v631_v14 = vpop.f32.mrf.mxu1 }
 0x21e   :  { %v665_v15 = vpack.c.bf16 %v631_v14, %v629_v23 }
 0x220   :  { %753 = vmatmul.bf16.gmra.mxu2 %v665_v15 }
 0x225   :  { %v634_v16 = vpop.f32.mrf.mxu1 }
 0x22d   :  { %v636_v25 = vpop.f32.mrf.mxu1 }
 0x22e   :  { %v666_v28 = vpack.c.bf16 %v636_v25, %v634_v16 }
 0x230   :  { %758 = vmatmul.bf16.gmra.mxu2 %v666_v28 }
 0x235   :  { %v639_v33 = vpop.f32.mrf.mxu1 }
 0x23d   :  { %v641_v19 = vpop.f32.mrf.mxu1 }
 0x23e   :  { %v667_v35 = vpack.c.bf16 %v641_v19, %v639_v33  ;;  %v1575_v19 = vld [vmem:[%s2253_s5 + $0x78] sm:$0xff] }
 0x23f   :  { %956 = vmatpush.bf16.msrb.mxu0 %v1575_v19 }
 0x240   :  { %763 = vmatmul.bf16.gmra.mxu2 %v667_v35  ;;  %v1574_v35 = vld [vmem:[%s2253_s5 + $0x70] sm:$0xff] }
 0x243   :  { %957 = vmatpush.bf16.msrb.mxu0 %v1574_v35 }
 0x245   :  { %v644_v34 = vpop.f32.mrf.mxu1 }
 0x24d   :  { %v646_v13 = vpop.f32.mrf.mxu1 }
 0x24e   :  { %v668_v39 = vpack.c.bf16 %v646_v13, %v644_v34 }
 0x250   :  { %768 = vmatmul.bf16.gmra.mxu2 %v668_v39 }
 0x255   :  { %v649_v27 = vpop.f32.mrf.mxu1 }
 0x25d   :  { %v651_v40 = vpop.f32.mrf.mxu1 }
 0x25e   :  { %v669_v59 = vpack.c.bf16 %v651_v40, %v649_v27 }
 0x260   :  { %773 = vmatmul.bf16.gmra.mxu2 %v669_v59 }
 0x265   :  { %v654_v1 = vpop.f32.mrf.mxu1 }
 0x26d   :  { %v656_v41 = vpop.f32.mrf.mxu1 }
 0x26e   :  { %v670_v42 = vpack.c.bf16 %v656_v41, %v654_v1 }
 0x270   :  { %778 = vmatmul.bf16.gmra.mxu2 %v670_v42 }
 0x275   :  { %v659_v43 = vpop.f32.mrf.mxu1 }
 0x27d   :  { %v661_v20 = vpop.f32.mrf.mxu1 }
 0x27e   :  { %v671_v45 = vpack.c.bf16 %v661_v20, %v659_v43 }
 0x280   :  { %783 = vmatmul.bf16.gmra.mxu2 %v671_v45 }
 0x293   :  { %v749_v36 = vpop.f32.mrf.mxu2 }
 0x294   :  { %v750_v52 = vadd.f32 %v1608_v46, %v749_v36 }
 0x29b   :  { %v751_v49 = vpop.f32.mrf.mxu2 }
 0x29c   :  { %v752_v50 = vadd.f32 %v1608_v46, %v751_v49 }
 0x29e   :  { %v821_v37 = vpack.c.bf16 %v752_v50, %v750_v52 }
 0x2a3   :  { %v754_v53 = vpop.f32.mrf.mxu2 }
 0x2a4   :  { %v755_v29 = vadd.f32 %v1608_v46, %v754_v53 }
 0x2ab   :  { %v756_v54 = vpop.f32.mrf.mxu2 }
 0x2ac   :  { %v757_v30 = vadd.f32 %v1608_v46, %v756_v54 }
 0x2ae   :  { %v822_v18 = vpack.c.bf16 %v757_v30, %v755_v29 }
 0x2b3   :  { %v759_v47 = vpop.f32.mrf.mxu2 }
 0x2b4   :  { %v760_v51 = vadd.f32 %v1608_v46, %v759_v47  ;;  %v1609_v47 = vld [vmem:[%s2254_s6 + $0x1] ss:$0 sm:$0xff]  ;;  %s1675_s6 = smov [#allocation3]  }
 0x2bb   :  { %v761_v22 = vpop.f32.mrf.mxu2 }
 0x2bc   :  { %v762_v17 = vadd.f32 %v1608_v46, %v761_v22 }
 0x2be   :  { %v823_v56 = vpack.c.bf16 %v762_v17, %v760_v51 }
 0x2c3   :  { %v764_v57 = vpop.f32.mrf.mxu2 }
 0x2c4   :  { %v765_v62 = vadd.f32 %v1608_v46, %v764_v57 }
 0x2cb   :  { %v766_v60 = vpop.f32.mrf.mxu2 }
 0x2cc   :  { %v767_v63 = vadd.f32 %v1608_v46, %v766_v60 }
 0x2ce   :  { %v824_v0 = vpack.c.bf16 %v767_v63, %v765_v62 }
 0x2d3   :  { %v769_v2 = vpop.f32.mrf.mxu2 }
 0x2d4   :  { %v770_v28 = vadd.f32 %v1608_v46, %v769_v2 }
 0x2db   :  { %v771_v31 = vpop.f32.mrf.mxu2 }
 0x2dc   :  { %v772_v16 = vadd.f32 %v1608_v46, %v771_v31 }
 0x2de   :  { %v825_v33 = vpack.c.bf16 %v772_v16, %v770_v28 }
 0x2e3   :  { %v774_v24 = vpop.f32.mrf.mxu2 }
 0x2e4   :  { %v775_v15 = vadd.f32 %v1608_v46, %v774_v24 }
 0x2eb   :  { %v776_v3 = vpop.f32.mrf.mxu2 }
 0x2ec   :  { %v777_v23 = vadd.f32 %v1608_v46, %v776_v3 }
 0x2ee   :  { %v826_v25 = vpack.c.bf16 %v777_v23, %v775_v15 }
 0x2f3   :  { %v779_v4 = vpop.f32.mrf.mxu2 }
 0x2f4   :  { %v780_v32 = vadd.f32 %v1608_v46, %v779_v4 }
 0x2fb   :  { %v781_v48 = vpop.f32.mrf.mxu2 }
 0x2fc   :  { %v782_v12 = vadd.f32 %v1608_v46, %v781_v48 }
 0x2fe   :  { %v827_v14 = vpack.c.bf16 %v782_v12, %v780_v32 }
 0x303   :  { %v784_v5 = vpop.f32.mrf.mxu2 }
 0x304   :  { %v785_v9 = vadd.f32 %v1608_v46, %v784_v5 }
 0x30b   :  { %v786_v8 = vpop.f32.mrf.mxu2 }
 0x30c   :  { %v787_v10 = vadd.f32 %v1608_v46, %v786_v8 }
 0x30e   :  { %v828_v21 = vpack.c.bf16 %v787_v10, %v785_v9 }
 0x310   :  { %829 = vmatpush.bf16.msrb.mxu3 %v828_v21 }
 0x314   :  { %830 = vmatpush.bf16.msrb.mxu3 %v827_v14 }
 0x318   :  { %831 = vmatpush.bf16.msrb.mxu3 %v826_v25 }
 0x31c   :  { %832 = vmatpush.bf16.msrb.mxu3 %v825_v33 }
 0x320   :  { %833 = vmatpush.bf16.msrb.mxu3 %v824_v0 }
 0x324   :  { %834 = vmatpush.bf16.msrb.mxu3 %v823_v56 }
 0x328   :  { %835 = vmatpush.bf16.msrb.mxu3 %v822_v18 }
 0x32c   :  { %836 = vmatpush.bf16.msrb.mxu3 %v821_v37 }
 0x32f   :  { %837 = vmatmul.bf16.vlgmr.msrb.gmra.mxu3 %v2075_v38  ;;  %v1573_v38 = vld [vmem:[%s2253_s5 + $0x68] sm:$0xff] }
 0x330   :  { %958 = vmatpush.bf16.msrb.mxu0 %v1573_v38 }
 0x33f   :  { %842 = vmatmul.bf16.gmra.mxu3 %v2078_v55  ;;  %v1572_v55 = vld [vmem:[%s2253_s5 + $0x60] sm:$0xff] }
 0x340   :  { %959 = vmatpush.bf16.msrb.mxu0 %v1572_v55  ;;  %v1591_v55 = vld [vmem:[%s2256_s8 + $0x38] sm:$0xff] }
 0x341   :  { %1169 = vmatpush.bf16.msra.mxu3 %v1591_v55 }
 0x34f   :  { %847 = vmatmul.bf16.gmra.mxu3 %v2081_v7  ;;  %v1571_v7 = vld [vmem:[%s2253_s5 + $0x58] sm:$0xff] }
 0x350   :  { %960 = vmatpush.bf16.msrb.mxu0 %v1571_v7 }
 0x35f   :  { %852 = vmatmul.bf16.gmra.mxu3 %v2084_v26  ;;  %v1570_v26 = vld [vmem:[%s2253_s5 + $0x50] sm:$0xff] }
 0x360   :  { %961 = vmatpush.bf16.msrb.mxu0 %v1570_v26 }
 0x36f   :  { %857 = vmatmul.bf16.gmra.mxu3 %v2087_v58  ;;  %v1569_v58 = vld [vmem:[%s2253_s5 + $0x48] sm:$0xff] }
 0x370   :  { %962 = vmatpush.bf16.msrb.mxu0 %v1569_v58 }
 0x37f   :  { %862 = vmatmul.bf16.gmra.mxu3 %v2096_v61  ;;  %v1568_v61 = vld [vmem:[%s2253_s5 + $0x40] sm:$0xff] }
 0x380   :  { %963 = vmatpush.bf16.msrb.mxu0 %v1568_v61  ;;  %v1590_v61 = vld [vmem:[%s2256_s8 + $0x30] sm:$0xff] }
 0x381   :  { %1170 = vmatpush.bf16.msra.mxu3 %v1590_v61 }
 0x38f   :  { %867 = vmatmul.bf16.gmra.mxu3 %v2114_v6 }
 0x39f   :  { %872 = vmatmul.bf16.gmra.mxu3 %v2120_v11 }
 0x3b2   :  { %v838_v34 = vpop.f32.mrf.mxu3 }
 0x3ba   :  { %v840_v13 = vpop.f32.mrf.mxu3 }
 0x3bb   :  { %v878_v6 = vpack.c.bf16 %v840_v13, %v838_v34 }
 0x3bd   :  { %964 = vmatmul.bf16.vlgmr.msrb.gmra.mxu0 %v878_v6 }
 0x3c2   :  { %v843_v39 = vpop.f32.mrf.mxu3 }
 0x3ca   :  { %v845_v27 = vpop.f32.mrf.mxu3 }
 0x3cb   :  { %v879_v40 = vpack.c.bf16 %v845_v27, %v843_v39  ;;  %v1589_v39 = vld [vmem:[%s2256_s8 + $0x28] sm:$0xff] }
 0x3cc   :  { %1171 = vmatpush.bf16.msra.mxu3 %v1589_v39 }
 0x3cd   :  { %969 = vmatmul.bf16.gmra.mxu0 %v879_v40  ;;  %v1588_v40 = vld [vmem:[%s2256_s8 + $0x20] sm:$0xff] }
 0x3d0   :  { %1172 = vmatpush.bf16.msra.mxu3 %v1588_v40 }
 0x3d2   :  { %v848_v59 = vpop.f32.mrf.mxu3 }
 0x3da   :  { %v850_v1 = vpop.f32.mrf.mxu3 }
 0x3db   :  { %v880_v41 = vpack.c.bf16 %v850_v1, %v848_v59  ;;  %v1587_v59 = vld [vmem:[%s2256_s8 + $0x18] sm:$0xff]  ;;  %v1586_v1 = vld [vmem:[%s2256_s8 + $0x10] sm:$0xff] }
 0x3dc   :  { %1173 = vmatpush.bf16.msra.mxu3 %v1587_v59 }
 0x3dd   :  { %974 = vmatmul.bf16.gmra.mxu0 %v880_v41  ;;  %v1056_v41 = vpop.permute.xlu2 %1055 }
 0x3de   :  { %vm1057_vm4 = vcmp.eq.s32.totalorder %v1896_v44, %v1056_v41 }
 0x3df   :  { %vm1461_vm6 = vmpackc.low %vm1057_vm4, %vm1057_vm4 }
 0x3e0   :  { %1174 = vmatpush.bf16.msra.mxu3 %v1586_v1 }
 0x3e2   :  { %v853_v42 = vpop.f32.mrf.mxu3 }
 0x3ea   :  { %v855_v43 = vpop.f32.mrf.mxu3 }
 0x3eb   :  { %v881_v20 = vpack.c.bf16 %v855_v43, %v853_v42  ;;  %v1048_v42 = vpop.permute.xlu0 %1047  ;;  %v1583_v43 = vld [vmem:[%s2255_s7 + $0x38] sm:$0xff] }
 0x3ec   :  { %vm1049_vm5 = vcmp.eq.s32.totalorder %v1896_v44, %v1048_v42  ;;  %v1580_v44 = vld [vmem:[%s2255_s7 + $0x20] sm:$0xff] }
 0x3ed   :  { %979 = vmatmul.bf16.gmra.mxu0 %v881_v20  ;;  %v1582_v20 = vld [vmem:[%s2255_s7 + $0x30] sm:$0xff]  ;;  %vm1459_vm7 = vmpackc.low %vm1049_vm5, %vm1049_vm5 }
 0x3f2   :  { %v858_v45 = vpop.f32.mrf.mxu3 }
 0x3fa   :  { %v860_v36 = vpop.f32.mrf.mxu3 }
 0x3fb   :  { %v882_v46 = vpack.c.bf16 %v860_v36, %v858_v45  ;;  %v1674_v45 = vmov 1.0|1.0   ;;  %v1581_v36 = vld [vmem:[%s2255_s7 + $0x28] sm:$0xff] }
 0x3fd   :  { %984 = vmatmul.bf16.gmra.mxu0 %v882_v46  ;;  %v1579_v46 = vld [vmem:[%s2255_s7 + $0x18] sm:$0xff] }
 0x402   :  { %v863_v11 = vpop.f32.mrf.mxu3 }
 0x40a   :  { %v865_v49 = vpop.f32.mrf.mxu3 }
 0x40b   :  { %v883_v52 = vpack.c.bf16 %v865_v49, %v863_v11  ;;  %v1578_v11 = vld [vmem:[%s2255_s7 + $0x10] sm:$0xff]  ;;  %v1577_v49 = vld [vmem:[%s2255_s7 + $0x8] sm:$0xff] }
 0x40d   :  { %989 = vmatmul.bf16.gmra.mxu0 %v883_v52  ;;  %v1576_v52 = vld [vmem:[%s2255_s7] sm:$0xff] }
 0x412   :  { %v868_v50 = vpop.f32.mrf.mxu3 }
 0x41a   :  { %v870_v37 = vpop.f32.mrf.mxu3 }
 0x41b   :  { %v884_v53 = vpack.c.bf16 %v870_v37, %v868_v50  ;;  %v1585_v50 = vld [vmem:[%s2256_s8 + $0x8] sm:$0xff]  ;;  %v1584_v37 = vld [vmem:[%s2256_s8] sm:$0xff] }
 0x41c   :  { %1175 = vmatpush.bf16.msra.mxu3 %v1585_v50 }
 0x41d   :  { %994 = vmatmul.bf16.gmra.mxu0 %v884_v53  ;;  %v1599_v53 = vld [vmem:[%s2258_s10 + $0x38] sm:$0xff] }
 0x420   :  { %1176 = vmatpush.bf16.msra.mxu3 %v1584_v37 }
 0x422   :  { %v873_v54 = vpop.f32.mrf.mxu3 }
 0x42a   :  { %v875_v29 = vpop.f32.mrf.mxu3 }
 0x42b   :  { %v885_v30 = vpack.c.bf16 %v875_v29, %v873_v54  ;;  %v1598_v54 = vld [vmem:[%s2258_s10 + $0x30] sm:$0xff]  ;;  %v1597_v29 = vld [vmem:[%s2258_s10 + $0x28] sm:$0xff] }
 0x42d   :  { %999 = vmatmul.bf16.gmra.mxu0 %v885_v30 }
 0x43a   :  { %v965_v18 = vpop.f32.mrf.mxu0 }
 0x43b   :  { %v966_v51 = vadd.f32 %v1609_v47, %v965_v18 }
 0x442   :  { %v967_v22 = vpop.f32.mrf.mxu0 }
 0x443   :  { %v968_v17 = vadd.f32 %v1609_v47, %v967_v22 }
 0x445   :  { %v2161_v56 = vpack.c.bf16 %v968_v17, %v966_v51 }
 0x44a   :  { %v970_v57 = vpop.f32.mrf.mxu0 }
 0x44b   :  { %v971_v62 = vadd.f32 %v1609_v47, %v970_v57  ;;  %v1595_v57 = vld [vmem:[%s2258_s10 + $0x18] sm:$0xff] }
 0x452   :  { %v972_v60 = vpop.f32.mrf.mxu0 }
 0x453   :  { %v973_v63 = vadd.f32 %v1609_v47, %v972_v60  ;;  %v1594_v60 = vld [vmem:[%s2258_s10 + $0x10] sm:$0xff] }
 0x455   :  { %v1038_v0 = vpack.c.bf16 %v973_v63, %v971_v62  ;;  %v1593_v62 = vld [vmem:[%s2258_s10 + $0x8] sm:$0xff]  ;;  %v1592_v63 = vld [vmem:[%s2258_s10] sm:$0xff] }
 0x45a   :  { %v975_v2 = vpop.f32.mrf.mxu0 }
 0x45b   :  { %v976_v24 = vadd.f32 %v1609_v47, %v975_v2 }
 0x462   :  { %v977_v31 = vpop.f32.mrf.mxu0 }
 0x463   :  { %v978_v3 = vadd.f32 %v1609_v47, %v977_v31  ;;  %v1610_v31 = vld [vmem:[%s2257_s9] ss:$0 sm:$0xff] }
 0x465   :  { %v1039_v4 = vpack.c.bf16 %v978_v3, %v976_v24 }
 0x46a   :  { %v980_v48 = vpop.f32.mrf.mxu0 }
 0x46b   :  { %v981_v8 = vadd.f32 %v1609_v47, %v980_v48 }
 0x472   :  { %v982_v5 = vpop.f32.mrf.mxu0 }
 0x473   :  { %v983_v9 = vadd.f32 %v1609_v47, %v982_v5 }
 0x475   :  { %v1040_v10 = vpack.c.bf16 %v983_v9, %v981_v8  ;;  %v1611_v9 = vld [vmem:[%s2259_s11] ss:$0 sm:$0xff] }
 0x47a   :  { %v985_v12 = vpop.f32.mrf.mxu0 }
 0x47b   :  { %v986_v6 = vadd.f32 %v1609_v47, %v985_v12 }
 0x482   :  { %v987_v21 = vpop.f32.mrf.mxu0 }
 0x483   :  { %v988_v34 = vadd.f32 %v1609_v47, %v987_v21 }
 0x485   :  { %v1041_v27 = vpack.c.bf16 %v988_v34, %v986_v6 }
 0x48a   :  { %v990_v32 = vpop.f32.mrf.mxu0 }
 0x48b   :  { %v991_v58 = vadd.f32 %v1609_v47, %v990_v32 }
 0x492   :  { %v992_v23 = vpop.f32.mrf.mxu0 }
 0x493   :  { %v993_v7 = vadd.f32 %v1609_v47, %v992_v23 }
 0x495   :  { %v1042_v13 = vpack.c.bf16 %v993_v7, %v991_v58 }
 0x49a   :  { %v995_v14 = vpop.f32.mrf.mxu0 }
 0x49b   :  { %v996_v38 = vadd.f32 %v1609_v47, %v995_v14 }
 0x4a2   :  { %v997_v15 = vpop.f32.mrf.mxu0 }
 0x4a3   :  { %v998_v19 = vadd.f32 %v1609_v47, %v997_v15 }
 0x4a5   :  { %v1043_v26 = vpack.c.bf16 %v998_v19, %v996_v38 }
 0x4aa   :  { %v1000_v16 = vpop.f32.mrf.mxu0 }
 0x4ab   :  { %v1001_v28 = vadd.f32 %v1609_v47, %v1000_v16 }
 0x4b2   :  { %v1002_v25 = vpop.f32.mrf.mxu0 }
 0x4b3   :  { %v1003_v33 = vadd.f32 %v1609_v47, %v1002_v25 }
 0x4b5   :  { %v1044_v35 = vpack.c.bf16 %v1003_v33, %v1001_v28 }
 0x4b7   :  { %1061 = vmatpush.bf16.msrb.mxu1 %v1044_v35  ;;  %1074 = vmatpush.bf16.msrb.mxu2 %v1044_v35 }
 0x4bb   :  { %1062 = vmatpush.bf16.msrb.mxu1 %v1043_v26  ;;  %1075 = vmatpush.bf16.msrb.mxu2 %v1043_v26 }
 0x4bf   :  { %1063 = vmatpush.bf16.msrb.mxu1 %v1042_v13  ;;  %1076 = vmatpush.bf16.msrb.mxu2 %v1042_v13 }
 0x4c3   :  { %1064 = vmatpush.bf16.msrb.mxu1 %v1041_v27  ;;  %1077 = vmatpush.bf16.msrb.mxu2 %v1041_v27 }
 0x4c7   :  { %1065 = vmatpush.bf16.msrb.mxu1 %v1040_v10  ;;  %1078 = vmatpush.bf16.msrb.mxu2 %v1040_v10 }
 0x4cb   :  { %1066 = vmatpush.bf16.msrb.mxu1 %v1039_v4  ;;  %1079 = vmatpush.bf16.msrb.mxu2 %v1039_v4 }
 0x4cf   :  { %1067 = vmatpush.bf16.msrb.mxu1 %v1038_v0  ;;  %1080 = vmatpush.bf16.msrb.mxu2 %v1038_v0 }
 0x4d3   :  { %1068 = vmatpush.bf16.msrb.mxu1 %v2161_v56  ;;  %1081 = vmatpush.bf16.msrb.mxu2 %v2161_v56  ;;  %v1596_v56 = vld [vmem:[%s2258_s10 + $0x20] sm:$0xff]  ;;  %s1337_s10 = sshll.u32 %s1675_s6, 4  ;;  %s1338_s10 = int_to_ptr.vmem [resolvable:$true] %s1337_s10 }
 0x4d6   :  { %1460 = vmatmul.msk.bf16.vlgmr.msrb.gmra.mxu1 %vm1459_vm7, %v1674_v45  ;;  %1462 = vmatmul.msk.bf16.vlgmr.msrb.gmra.mxu2 %vm1461_vm6, %v1674_v45 }
 0x4d7   :  { %1230 = vmatpush.bf16.msra.mxu1 %v1583_v43  ;;  %1318 = vmatpush.bf16.msra.mxu2 %v1599_v53 }
 0x4db   :  { %1231 = vmatpush.bf16.msra.mxu1 %v1582_v20  ;;  %1319 = vmatpush.bf16.msra.mxu2 %v1598_v54 }
 0x4df   :  { %1232 = vmatpush.bf16.msra.mxu1 %v1581_v36  ;;  %1320 = vmatpush.bf16.msra.mxu2 %v1597_v29 }
 0x4e3   :  { %1233 = vmatpush.bf16.msra.mxu1 %v1580_v44  ;;  %1321 = vmatpush.bf16.msra.mxu2 %v1596_v56 }
 0x4e7   :  { %1234 = vmatpush.bf16.msra.mxu1 %v1579_v46  ;;  %1322 = vmatpush.bf16.msra.mxu2 %v1595_v57 }
 0x4eb   :  { %1235 = vmatpush.bf16.msra.mxu1 %v1578_v11  ;;  %1323 = vmatpush.bf16.msra.mxu2 %v1594_v60 }
 0x4ef   :  { %1236 = vmatpush.bf16.msra.mxu1 %v1577_v49  ;;  %1324 = vmatpush.bf16.msra.mxu2 %v1593_v62 }
 0x4f3   :  { %1237 = vmatpush.bf16.msra.mxu1 %v1576_v52  ;;  %1325 = vmatpush.bf16.msra.mxu2 %v1592_v63 }
 0x553   :  { %v1070_v30 = vpop.f32.mrf.mxu1 }
 0x554   :  { %v1087_v18 = vpack.c.bf16 %v1070_v30, %v1070_v30 }
 0x556   :  { %1238 = vmatmul.bf16.vlgmr.msra.gmra.mxu1 %v1087_v18 }
 0x559   :  { %v1083_v47 = vpop.f32.mrf.mxu2 }
 0x55a   :  { %v1104_v22 = vpack.c.bf16 %v1083_v47, %v1083_v47 }
 0x55b   :  { %v1072_v51 = vpop.f32.mrf.mxu1 }
 0x55c   :  { %1177 = vmatmul.bf16.vlgmr.msra.gmra.mxu3 %v1104_v22 }
 0x561   :  { %v1085_v17 = vpop.f32.mrf.mxu2 }
 0x5d3   :  { %v1239_v0 = vpop.f32.mrf.mxu1 }
 0x5db   :  { %v1241_v2 = vpop.f32.mrf.mxu1 }
 0x5df   :  { %v1178_v24 = vpop.f32.mrf.mxu3 }
 0x5e0   :  { %v1240_v3 = vadd.f32 %v1239_v0, %v1178_v24 }
 0x5e2   :  { %v1247_v4 = vadd.f32 %v1610_v31, %v1240_v3 }
 0x5e4   :  { %v1248_v48 = vmax.f32 %v1247_v4, 0.0 }
 0x5e6   :  { %v1249_v5 = vpack.c.bf16 %v1248_v48, %v1248_v48 }
 0x5e7   :  { %v1180_v8 = vpop.f32.mrf.mxu3 }
 0x5e8   :  { %1326 = vmatmul.bf16.vlgmr.msra.gmra.mxu2 %v1249_v5 }
 0x66b   :  { %v1327_v10 = vpop.f32.mrf.mxu2 }
 0x66c   :  { %v1328_v12 = vadd.f32 %v1611_v9, %v1327_v10 }
 0x66e   :  { %1331 = vst [vmem:[#allocation3] sm:$0xff] %v1328_v12 }
 0x66f   :  { %1342 = dma.vmem_to_hbm [thread:$0]  %s1338_s10, 128, %s1340_s25, [#allocation4]  }
 0x673   :  { %v1329_v21 = vpop.f32.mrf.mxu2 }
 0x674   :  { %1670 = dma.done.wait [#allocation4], 128  }
 0x675   :  { %1671 = vsyncadd [#allocation4], 4294967168 }
 0x676   :  { %1347 = vsyncpa [#allocation4], 1 }

</bundles_post_ra>
